<compile_context>
chip_gen: v6e
topology: v6e:2x2x1
jax: 0.10.0
libtpu: 0.0.40
codegen_flags: <defaults>
</compile_context>

<pallas_src>
import jax
import jax.numpy as jnp
from jax.experimental import pallas as pl
from jax.experimental.pallas import tpu as pltpu

LANE = 128
EPS = 1e-5


def mlp_kernel(x_ref, w1_ref, side_ref, w2_ref, a_ref, o_ref):
    # x_ref:    [B, inp]    f32
    # w1_ref:   [inp, Hp]   f32  (pre-transposed, zero-padded to 128 lanes)
    # side_ref: [8, 128]    f32  row0=gamma, row1=beta, row2=b2 (zero-padded)
    # w2_ref:   [Hp, 128]   f32  (pre-transposed, zero-padded)
    # a_ref:    [1]         f32  PReLU scalar (SMEM)
    # o_ref:    [B, outp]   f32  (true, unpadded output)
    x = x_ref[...]

    # ---- Linear 1 (MXU, f32 operands, f32 accumulation). b1 omitted:
    #      it cancels exactly under the training-mode BN mean subtraction. ----
    h = jnp.dot(x, w1_ref[...], preferred_element_type=jnp.float32)   # [B, Hp]

    # ---- BatchNorm1d (training mode: batch mean, biased variance) ----
    # Two independent sublane reductions back-to-back, then E[h^2] - mean^2.
    inv_b = 1.0 / h.shape[0]
    s1 = jnp.sum(h, axis=0, keepdims=True)          # [1, Hp]
    s2 = jnp.sum(h * h, axis=0, keepdims=True)      # [1, Hp]
    mean = s1 * inv_b
    var = s2 * inv_b - mean * mean

    side = side_ref[...]                            # single packed (8,128) tile
    gamma = side[0:1, :]
    beta = side[1:2, :]
    b2 = side[2:3, :]

    # gamma folded into inv-std -> one [1,Hp] multiply instead of [B,Hp].
    scale = gamma * jax.lax.rsqrt(var + EPS)
    hn = (h - mean) * scale + beta                  # [B, Hp]  (padded lanes stay 0)

    # ---- PReLU (single shared parameter, scalar from SMEM) ----
    a = a_ref[0]
    act = jnp.where(hn > 0, hn, a * hn)

    # ---- Linear 2 (MXU, f32). Padded lanes of `act` and padded rows of w2
    #      are exactly zero, so they contribute nothing. ----
    out = jnp.dot(act, w2_ref[...], preferred_element_type=jnp.float32) + b2   # [B, 128]

    # Store the true [B, outp] result directly: no post-kernel slice dispatch.
    o_ref[...] = out[:, : o_ref.shape[1]].astype(o_ref.dtype)


def prepare_params(w1, gamma, beta, prelu_a, w2, b2, *, lane=LANE):
    """One-time parameter prep: transpose, zero-pad to 128 lanes, pack the three
    small per-feature vectors into a single (8,128) tile.  b1 is intentionally
    not needed: training-mode BN cancels it exactly."""
    hidden, inp = w1.shape
    outp = w2.shape[0]
    assert hidden <= lane and outp <= lane, "TODO(synk): generalize packing for >128 features"
    hid_p = lane
    out_p = lane

    w1_t = jnp.zeros((inp, hid_p), jnp.float32).at[:, :hidden].set(
        w1.astype(jnp.float32).T)
    w2_t = jnp.zeros((hid_p, out_p), jnp.float32).at[:hidden, :outp].set(
        w2.astype(jnp.float32).T)

    # Single packed side-parameter tile -> one DMA stream instead of three.
    #   row 0: gamma  (ZERO padding keeps padded BN lanes exactly 0)
    #   row 1: beta
    #   row 2: b2
    side = jnp.zeros((8, lane), jnp.float32)
    side = side.at[0, :hidden].set(gamma.astype(jnp.float32))
    side = side.at[1, :hidden].set(beta.astype(jnp.float32))
    side = side.at[2, :outp].set(b2.astype(jnp.float32))

    a_sc = jnp.asarray(prelu_a, jnp.float32).reshape(1)    # SMEM scalar
    return dict(w1_t=w1_t, side=side, w2_t=w2_t, a=a_sc, outp=outp)


def mlp_forward(x, params):
    """x: [B, inp] float32; params from prepare_params().  Returns [B, outp]."""
    B = x.shape[0]
    outp = params["outp"]
    vmem = pl.BlockSpec(memory_space=pltpu.MemorySpace.VMEM)

    return pl.pallas_call(
        mlp_kernel,
        out_shape=jax.ShapeDtypeStruct((B, outp), jnp.float32),
        in_specs=[
            vmem,                                            # x
            vmem,                                            # w1_t
            vmem,                                            # packed gamma/beta/b2
            vmem,                                            # w2_t
            pl.BlockSpec(memory_space=pltpu.MemorySpace.SMEM),  # PReLU scalar
        ],
        out_specs=vmem,
    )(x, params["w1_t"], params["side"], params["w2_t"], params["a"])


if __name__ == "__main__":
    # Shapes implied by the module: inp_size=32, hidden_size=64, outp_size=16, batch=8.
    B, INP, HID, OUT = 8, 32, 64, 16

    key = jax.random.PRNGKey(0)
    k_x, k_w1, k_b1, k_w2, k_b2 = jax.random.split(key, 5)

    x = jax.random.normal(k_x, (B, INP), dtype=jnp.float32)

    # Deterministic parameter init (uniform, PyTorch-linear-like bound).
    bound1 = 1.0 / (INP ** 0.5)
    w1 = jax.random.uniform(k_w1, (HID, INP), jnp.float32, -bound1, bound1)
    b1 = jax.random.uniform(k_b1, (HID,), jnp.float32, -bound1, bound1)
    bound2 = 1.0 / (HID ** 0.5)
    w2 = jax.random.uniform(k_w2, (OUT, HID), jnp.float32, -bound2, bound2)
    b2 = jax.random.uniform(k_b2, (OUT,), jnp.float32, -bound2, bound2)
    gamma = jnp.ones((HID,), jnp.float32)          # BatchNorm1d weight init
    beta = jnp.zeros((HID,), jnp.float32)          # BatchNorm1d bias init
    prelu_a = 0.25                                 # PReLU default init

    params = prepare_params(w1, gamma, beta, prelu_a, w2, b2)  # one-time prep
    out = mlp_forward(x, params)
    jax.block_until_ready(out)
    assert out.shape == (B, OUT)

    # Check vs the full-f32 PyTorch-equivalent math (with b1).  The kernel now
    # runs f32 matmuls and dropping b1 is algebraically exact under training-mode
    # BN, so the tolerance is tight.
    h_f = x @ w1.T + b1
    mean_f = h_f.mean(0, keepdims=True)
    var_f = ((h_f - mean_f) ** 2).mean(0, keepdims=True)
    hn_f = (h_f - mean_f) / jnp.sqrt(var_f + 1e-5) * gamma + beta
    act_f = jnp.where(hn_f > 0, hn_f, prelu_a * hn_f)
    ref_f32 = act_f @ w2.T + b2
    assert jnp.allclose(out, ref_f32, atol=5e-4, rtol=5e-4), "mismatch vs f32 ref"

    print("KERNEL_OK")
</pallas_src>

<mosaic_0001>
module attributes {stable_mosaic.version = 11 : i64} {
  func.func @mlp_kernel(%arg0: memref<8x32xf32, #tpu.memory_space<vmem>>, %arg1: memref<32x128xf32, #tpu.memory_space<vmem>>, %arg2: memref<8x128xf32, #tpu.memory_space<vmem>>, %arg3: memref<128x128xf32, #tpu.memory_space<vmem>>, %arg4: memref<1xf32, #tpu.memory_space<smem>>, %arg5: memref<8x16xf32, #tpu.memory_space<vmem>>) attributes {dimension_semantics = [], scalar_prefetch = 0 : i64, scratch_operands = 0 : i64, tpu.core_type = #tpu.core_type<tc>} {
    %c0 = arith.constant 0 : index
    %c0_0 = arith.constant 0 : index
    %0 = vector.load %arg0[%c0, %c0_0] : memref<8x32xf32, #tpu.memory_space<vmem>>, vector<8x32xf32>
    %c0_1 = arith.constant 0 : index
    %c0_2 = arith.constant 0 : index
    %1 = vector.load %arg1[%c0_1, %c0_2] : memref<32x128xf32, #tpu.memory_space<vmem>>, vector<32x128xf32>
    %cst = arith.constant dense<0.000000e+00> : vector<8x128xf32>
    %2 = tpu.matmul %0, %1, %cst {dimension_numbers = #tpu.dot_dimension_numbers<[1], [0], [0], [1], [0, 0, 1, 1], [], []>} : vector<8x32xf32>, vector<32x128xf32>, vector<8x128xf32> -> vector<8x128xf32>
    %cst_3 = arith.constant dense<0.000000e+00> : vector<128xf32>
    %3 = vector.multi_reduction <add>, %2, %cst_3 [0] : vector<8x128xf32> to vector<128xf32>
    %4 = vector.shape_cast %3 : vector<128xf32> to vector<1x128xf32>
    %5 = arith.mulf %2, %2 : vector<8x128xf32>
    %cst_4 = arith.constant dense<0.000000e+00> : vector<128xf32>
    %6 = vector.multi_reduction <add>, %5, %cst_4 [0] : vector<8x128xf32> to vector<128xf32>
    %7 = vector.shape_cast %6 : vector<128xf32> to vector<1x128xf32>
    %cst_5 = arith.constant 1.250000e-01 : f32
    %8 = vector.broadcast %cst_5 : f32 to vector<1x128xf32>
    %9 = arith.mulf %4, %8 : vector<1x128xf32>
    %cst_6 = arith.constant 1.250000e-01 : f32
    %10 = vector.broadcast %cst_6 : f32 to vector<1x128xf32>
    %11 = arith.mulf %7, %10 : vector<1x128xf32>
    %12 = arith.mulf %9, %9 : vector<1x128xf32>
    %13 = arith.subf %11, %12 : vector<1x128xf32>
    %c0_7 = arith.constant 0 : index
    %c0_8 = arith.constant 0 : index
    %14 = vector.load %arg2[%c0_7, %c0_8] : memref<8x128xf32, #tpu.memory_space<vmem>>, vector<8x128xf32>
    %15 = vector.extract_strided_slice %14 {offsets = [0, 0], sizes = [1, 128], strides = [1, 1]} : vector<8x128xf32> to vector<1x128xf32>
    %16 = vector.extract_strided_slice %14 {offsets = [1, 0], sizes = [1, 128], strides = [1, 1]} : vector<8x128xf32> to vector<1x128xf32>
    %17 = vector.extract_strided_slice %14 {offsets = [2, 0], sizes = [1, 128], strides = [1, 1]} : vector<8x128xf32> to vector<1x128xf32>
    %cst_9 = arith.constant 9.99999974E-6 : f32
    %18 = vector.broadcast %cst_9 : f32 to vector<1x128xf32>
    %19 = arith.addf %13, %18 : vector<1x128xf32>
    %20 = math.rsqrt %19 : vector<1x128xf32>
    %21 = arith.mulf %15, %20 : vector<1x128xf32>
    %22 = vector.broadcast %9 : vector<1x128xf32> to vector<8x128xf32>
    %23 = arith.subf %2, %22 : vector<8x128xf32>
    %24 = vector.broadcast %21 : vector<1x128xf32> to vector<8x128xf32>
    %25 = arith.mulf %23, %24 : vector<8x128xf32>
    %26 = vector.broadcast %16 : vector<1x128xf32> to vector<8x128xf32>
    %27 = arith.addf %25, %26 : vector<8x128xf32>
    %c0_10 = arith.constant 0 : index
    %28 = memref.load %arg4[%c0_10] : memref<1xf32, #tpu.memory_space<smem>>
    %cst_11 = arith.constant 0.000000e+00 : f32
    %29 = vector.broadcast %cst_11 : f32 to vector<8x128xf32>
    %30 = arith.cmpf ogt, %27, %29 : vector<8x128xf32>
    %31 = vector.broadcast %28 : f32 to vector<8x128xf32>
    %32 = arith.mulf %31, %27 : vector<8x128xf32>
    %33 = arith.select %30, %27, %32 : vector<8x128xi1>, vector<8x128xf32>
    %c0_12 = arith.constant 0 : index
    %c0_13 = arith.constant 0 : index
    %34 = vector.load %arg3[%c0_12, %c0_13] : memref<128x128xf32, #tpu.memory_space<vmem>>, vector<128x128xf32>
    %cst_14 = arith.constant dense<0.000000e+00> : vector<8x128xf32>
    %35 = tpu.matmul %33, %34, %cst_14 {dimension_numbers = #tpu.dot_dimension_numbers<[1], [0], [0], [1], [0, 0, 1, 1], [], []>} : vector<8x128xf32>, vector<128x128xf32>, vector<8x128xf32> -> vector<8x128xf32>
    %36 = vector.broadcast %17 : vector<1x128xf32> to vector<8x128xf32>
    %37 = arith.addf %35, %36 : vector<8x128xf32>
    %38 = vector.extract_strided_slice %37 {offsets = [0, 0], sizes = [8, 16], strides = [1, 1]} : vector<8x128xf32> to vector<8x16xf32>
    %c0_15 = arith.constant 0 : index
    %c0_16 = arith.constant 0 : index
    %39 = vector.load %arg5[%c0_15, %c0_16] : memref<8x16xf32, #tpu.memory_space<vmem>>, vector<8x16xf32>
    tpu.vector_store %arg5[%c0_15, %c0_16], %38 {strides = array<i32>} : memref<8x16xf32, #tpu.memory_space<vmem>>, vector<8x16xf32>,
    return
  }
}

</mosaic_0001>

<bundles_post_ra>
// kernel: tpu_custom_call.1
= control target key start
LH: loop header
LB: loop body
LE: loop exit
PB: predicated region body
PF: predicated region fallthrough
CT: control target
= control target key end

     0   :  { %11 = vsyncpa [#allocation4], 0  ;;  %s571_s0 = inlined_call_operand.hbm [shape: f32[8,32], index: 0, kind: input, shape index: {}]   ;;  %s572_s1 = inlined_call_operand.hbm [shape: f32[32,128], index: 1, kind: input, shape index: {}]   ;;  %s573_s2 = inlined_call_operand.hbm [shape: f32[8,128], index: 2, kind: input, shape index: {}]   ;;  %s574_s3 = inlined_call_operand.hbm [shape: f32[128,128], index: 3, kind: input, shape index: {}]   ;;  %s575_s4 = inlined_call_operand.<no memory space> [shape: f32[1], index: 4, kind: input, shape index: {}]   ;;  %s576_s5 = inlined_call_operand.hbm [shape: f32[8,16], index: 5, kind: output, shape index: {}]  }
   0x1   :  { %12 = vsyncpa [#allocation7], 0 }
   0x2   :  { %13 = vsyncpa [#allocation10], 0 }
   0x3   :  { %14 = vsyncpa [#allocation5], 0  ;;  %s486_s18 = smov [#allocation6]  }
   0x4   :  { %s30_s19 = sshll.u32 %s486_s18, 4  ;;  %s31_s19 = int_to_ptr.vmem [resolvable:$true] %s30_s19 }
   0x5   :  { %s386_s20 = scalar_lea.vmem %s31_s19, 512  ;;  %p391_p1 = scmp.lt.s32.totalorder %s31_s19, %s31_s19 }
   0x6   :  { %p387_p0 = scmp.ne.s32.totalorder %s31_s19, %s386_s20  ;;  %p392_p2 = scmp.lt.s32.totalorder %s386_s20, %s386_s20 }
   0x8   :  { %p393_p3 = por %p392_p2, %p391_p1 }
   0xa   :  { %p394_p4 = pnand %p393_p3, %p387_p0 }
   0xc   :  { %397 = shalt.err (!%p394_p4)
}
   0xd   :  { %s487_s21 = smov 128   ;;  %s488_s22 = smov 8  }
   0xe   :  { %36 = dma.hbm_to_vmem [thread:$0]  %s572_s1, 512, %s31_s19, [#allocation7], %s487_s21, %s487_s21, %s488_s22  }
   0xf   :  { %s489_s25 = smov [#allocation3]   ;;  %s490_s27 = smov [#allocation8]  }
  0x10   :  { %s21_s26 = sshll.u32 %s489_s25, 4  ;;  %s43_s28 = sshll.u32 %s490_s27, 4  ;;  %s22_s26 = int_to_ptr.vmem [resolvable:$true] %s21_s26  ;;  %s44_s28 = int_to_ptr.vmem [resolvable:$true] %s43_s28 }
  0x11   :  { %s406_s29 = scalar_lea.vmem %s22_s26, 128  ;;  %p411_p6 = scmp.lt.s32.totalorder %s22_s26, %s22_s26 }
  0x12   :  { %p407_p5 = scmp.ne.s32.totalorder %s22_s26, %s406_s29  ;;  %p412_p7 = scmp.lt.s32.totalorder %s406_s29, %s406_s29 }
  0x14   :  { %p413_p8 = por %p412_p7, %p411_p6 }
  0x16   :  { %p414_p9 = pnand %p413_p8, %p407_p5 }
  0x18   :  { %417 = shalt.err (!%p414_p9)
}
  0x19   :  { %24 = dma.hbm_to_vmem [thread:$0]  %s571_s0, 128, %s22_s26, [#allocation4]  }
  0x1a   :  { %s426_s7 = scalar_lea.vmem %s44_s28, 128  ;;  %p431_p11 = scmp.lt.s32.totalorder %s44_s28, %s44_s28 }
  0x1b   :  { %p427_p10 = scmp.ne.s32.totalorder %s44_s28, %s426_s7  ;;  %p432_p12 = scmp.lt.s32.totalorder %s426_s7, %s426_s7 }
  0x1d   :  { %p433_p13 = por %p432_p12, %p431_p11 }
  0x1f   :  { %p434_p0 = pnand %p433_p13, %p427_p10 }
  0x21   :  { %437 = shalt.err (!%p434_p0)
}
  0x22   :  { %46 = dma.hbm_to_vmem [thread:$0]  %s573_s2, 128, %s44_s28, [#allocation7]  }
  0x23   :  { %s491_s9 = smov [#allocation9]  }
  0x24   :  { %s52_s10 = sshll.u32 %s491_s9, 4  ;;  %s53_s10 = int_to_ptr.vmem [resolvable:$true] %s52_s10 }
  0x25   :  { %s446_s11 = scalar_lea.vmem %s53_s10, 2048  ;;  %p451_p2 = scmp.lt.s32.totalorder %s53_s10, %s53_s10 }
  0x26   :  { %p447_p1 = scmp.ne.s32.totalorder %s53_s10, %s446_s11  ;;  %p452_p3 = scmp.lt.s32.totalorder %s446_s11, %s446_s11 }
  0x28   :  { %p453_p4 = por %p452_p3, %p451_p2 }
  0x2a   :  { %p454_p5 = pnand %p453_p4, %p447_p1 }
  0x2c   :  { %457 = shalt.err (!%p454_p5)
}
  0x2d   :  { %58 = dma.hbm_to_vmem [thread:$0]  %s574_s3, 2048, %s53_s10, [#allocation10], %s487_s21, %s487_s21, %s488_s22  }
  0x2e   :  { %478 = dma.done.wait [#allocation4], 128  }
  0x2f   :  { %479 = vsyncadd [#allocation4], 4294967168 }
  0x30   :  { %480 = dma.done.wait [#allocation7], 640  }
  0x31   :  { %481 = vsyncadd [#allocation7], 4294966656 }
  0x32   :  { %482 = dma.done.wait [#allocation10], 2048  }
  0x33   :  { %483 = vsyncadd [#allocation10], 4294965248  ;;  %v492_v0 = vmov 0.0   ;;  %vm493_vm0 = vmmov 0   ;;  %v77_v1 = vld [vmem:[#allocation6 + $0x18] sm:$0xff]  ;;  %v76_v2 = vld [vmem:[#allocation6 + $0x10] sm:$0xff]  ;;  %v174_v42 = vlaneseq  ;;  %v186_v53 = vstv %s575_s4 }
  0x34   :  { %321 = vmatprep.subr.mxu0 %v492_v0  ;;  %329 = vmatprep.mubr.msk.f32.mxu0 %vm493_vm0, %v492_v0  ;;  %v75_v3 = vld [vmem:[#allocation6 + $0x8] sm:$0xff]  ;;  %v74_v4 = vld [vmem:[#allocation6] sm:$0xff]  ;;  %v73_v5 = vld [vmem:[#allocation3] sm:$0xff]  ;;  %vm78_vm1 = vcmask 261120   ;;  %s494_s13 = smov [#allocation11]   ;;  %vm279_vm3 = vcmask 130048  }
  0x35   :  { %332 = vmatprep.subr.mxu1 %v492_v0  ;;  %364 = vmatprep.mubr.msk.f32.mxu1 %vm493_vm0, %v492_v0  ;;  %v204_v6 = vld [vmem:[#allocation9 + $0x78] sm:$0xff]  ;;  %v203_v7 = vld [vmem:[#allocation9 + $0x70] sm:$0xff]  ;;  %v202_v8 = vld [vmem:[#allocation9 + $0x68] sm:$0xff]  ;;  %v175_v43 = vshrl.u32 %v174_v42, 7  ;;  %s287_s14 = sshll.u32 %s494_s13, 4  ;;  %s288_s14 = int_to_ptr.vmem [resolvable:$true] %s287_s14 }
  0x36   :  { %322 = vmatpush3.msra.mxu0 %v77_v1  ;;  %333 = vmatpush3.msra.mxu1 %v204_v6  ;;  %v201_v9 = vld [vmem:[#allocation9 + $0x60] sm:$0xff]  ;;  %v200_v10 = vld [vmem:[#allocation9 + $0x58] sm:$0xff]  ;;  %v199_v11 = vld [vmem:[#allocation9 + $0x50] sm:$0xff]  ;;  %s458_s15 = scalar_lea.vmem %s288_s14, 128  ;;  %p463_p7 = scmp.lt.s32.totalorder %s288_s14, %s288_s14 }
  0x37   :  { %323 = vmatprep.subr.mxu0 %v492_v0  ;;  %334 = vmatprep.subr.mxu1 %v492_v0  ;;  %v198_v12 = vld [vmem:[#allocation9 + $0x48] sm:$0xff]  ;;  %v197_v13 = vld [vmem:[#allocation9 + $0x40] sm:$0xff]  ;;  %v196_v14 = vld [vmem:[#allocation9 + $0x38] sm:$0xff]  ;;  %v176_v45 = vsub.s32 0, %v175_v43  ;;  %v181_v46 = vsub.s32 1, %v175_v43  ;;  %v207_v57 = vsub.s32 2, %v175_v43  ;;  %p459_p6 = scmp.ne.s32.totalorder %s288_s14, %s458_s15  ;;  %p464_p8 = scmp.lt.s32.totalorder %s458_s15, %s458_s15 }
  0x38   :  { %324 = vmatpush3.msra.mxu0 %v76_v2  ;;  %335 = vmatpush3.msra.mxu1 %v203_v7  ;;  %v195_v15 = vld [vmem:[#allocation9 + $0x30] sm:$0xff]  ;;  %v194_v16 = vld [vmem:[#allocation9 + $0x28] sm:$0xff]  ;;  %v193_v17 = vld [vmem:[#allocation9 + $0x20] sm:$0xff] }
  0x39   :  { %325 = vmatprep.subr.mxu0 %v492_v0  ;;  %336 = vmatprep.subr.mxu1 %v492_v0  ;;  %v192_v18 = vld [vmem:[#allocation9 + $0x18] sm:$0xff]  ;;  %v191_v19 = vld [vmem:[#allocation9 + $0x10] sm:$0xff]  ;;  %v190_v20 = vld [vmem:[#allocation9 + $0x8] sm:$0xff]  ;;  %p465_p9 = por %p464_p8, %p463_p7 }
  0x3a   :  { %326 = vmatpush3.msra.mxu0 %v75_v3  ;;  %337 = vmatpush3.msra.mxu1 %v202_v8  ;;  %v189_v21 = vld [vmem:[#allocation9] sm:$0xff]  ;;  %v169_v44 = vld [vmem:[#allocation8] sm:$0xff] }
  0x3b   :  { %327 = vmatprep.subr.mxu0 %v492_v0  ;;  %338 = vmatprep.subr.mxu1 %v492_v0  ;;  %v182_v51 = vrot.slane %v169_v44, %v181_v46  ;;  %v208_v58 = vrot.slane %v169_v44, %v207_v57  ;;  %p466_p10 = pnand %p465_p9, %p459_p6 }
  0x3c   :  { %328 = vmatpush3.msra.mxu0 %v74_v4  ;;  %339 = vmatpush3.msra.mxu1 %v201_v9 }
  0x3d   :  { %330 = vmatmul.mubr.msk.f32.vlgmr.msra.gmra.mxu0 %vm78_vm1, %v73_v5  ;;  %340 = vmatprep.subr.mxu1 %v492_v0 }
  0x3e   :  { %341 = vmatpush3.msra.mxu1 %v200_v10 }
  0x3f   :  { %342 = vmatprep.subr.mxu1 %v492_v0 }
  0x40   :  { %343 = vmatpush3.msra.mxu1 %v199_v11 }
  0x41   :  { %344 = vmatprep.subr.mxu1 %v492_v0 }
  0x42   :  { %345 = vmatpush3.msra.mxu1 %v198_v12 }
  0x43   :  { %346 = vmatprep.subr.mxu1 %v492_v0 }
  0x44   :  { %347 = vmatpush3.msra.mxu1 %v197_v13 }
  0x45   :  { %348 = vmatprep.subr.mxu1 %v492_v0 }
  0x46   :  { %349 = vmatpush3.msra.mxu1 %v196_v14 }
  0x47   :  { %350 = vmatprep.subr.mxu1 %v492_v0 }
  0x48   :  { %351 = vmatpush3.msra.mxu1 %v195_v15 }
  0x49   :  { %352 = vmatprep.subr.mxu1 %v492_v0 }
  0x4a   :  { %353 = vmatpush3.msra.mxu1 %v194_v16 }
  0x4b   :  { %354 = vmatprep.subr.mxu1 %v492_v0 }
  0x4c   :  { %355 = vmatpush3.msra.mxu1 %v193_v17 }
  0x4d   :  { %356 = vmatprep.subr.mxu1 %v492_v0 }
  0x4e   :  { %357 = vmatpush3.msra.mxu1 %v192_v18 }
  0x4f   :  { %358 = vmatprep.subr.mxu1 %v492_v0 }
  0x50   :  { %359 = vmatpush3.msra.mxu1 %v191_v19 }
  0x51   :  { %360 = vmatprep.subr.mxu1 %v492_v0 }
  0x52   :  { %361 = vmatpush3.msra.mxu1 %v190_v20 }
  0x53   :  { %362 = vmatprep.subr.mxu1 %v492_v0 }
  0x54   :  { %363 = vmatpush3.msra.mxu1 %v189_v21 }
  0xfd   :  { %v148_v22 = vpop.f32.mrf.mxu0 }
  0xfe   :  { %v152_v23 = vrot.slane %v148_v22, 4  ;;  %v158_v24 = vmul.f32 %v148_v22, %v148_v22 }
  0xff   :  { %v331_v25 = vpop.f32.mrf.mxu0 }
 0x100   :  { %v153_v26 = vadd.f32 %v152_v23, %v148_v22  ;;  %v159_v27 = vrot.slane %v158_v24, 4 }
 0x102   :  { %v154_v28 = vrot.slane %v153_v26, 2  ;;  %v160_v29 = vadd.f32 %v159_v27, %v158_v24 }
 0x104   :  { %v155_v30 = vadd.f32 %v154_v28, %v153_v26  ;;  %v161_v31 = vrot.slane %v160_v29, 2 }
 0x106   :  { %v156_v32 = vrot.slane %v155_v30, 1  ;;  %v162_v33 = vadd.f32 %v161_v31, %v160_v29 }
 0x108   :  { %v157_v34 = vadd.f32 %v156_v32, %v155_v30  ;;  %v163_v35 = vrot.slane %v162_v33, 1 }
 0x10a   :  { %v164_v36 = vadd.f32 %v163_v35, %v162_v33  ;;  %v165_v37 = vmul.f32 0.125, %v157_v34 }
 0x10c   :  { %v166_v38 = vmul.f32 0.125, %v164_v36  ;;  %v167_v39 = vmul.f32 %v165_v37, %v165_v37  ;;  %v173_v49 = vsub.f32 %v148_v22, %v165_v37 }
 0x10e   :  { %v168_v40 = vsub.f32 %v166_v38, %v167_v39 }
 0x110   :  { %v170_v41 = vadd.f32 1e-05, %v168_v40 }
 0x112   :  { %376 = vrsqrt.f32 %v170_v41 }
 0x11f   :  { %v377_v47 = vpop.eup %376 }
 0x120   :  { %v172_v48 = vmul.f32 %v377_v47, %v169_v44 }
 0x122   :  { %v177_v50 = vrot.slane %v172_v48, %v176_v45 }
 0x124   :  { %v178_v52 = vmul.f32 %v177_v50, %v173_v49 }
 0x126   :  { %v183_v54 = vadd.f32 %v182_v51, %v178_v52 }
 0x128   :  { %vm185_vm2 = vcmp.gt.f32.partialorder %v183_v54, 0.0  ;;  %v187_v55 = vmul.f32 %v186_v53, %v183_v54 }
 0x12a   :  { %v188_v56 = vsel %vm185_vm2, %v183_v54, %v187_v55 }
 0x12b   :  { %365 = vmatmul.mubr.f32.vlgmr.msra.gmra.mxu1 %v188_v56 }
 0x1eb   :  { %v275_v59 = vpop.f32.mrf.mxu1 }
 0x1ec   :  { %v276_v60 = vadd.f32 %v275_v59, %v208_v58 }
 0x1ed   :  { %v366_v61 = vpop.f32.mrf.mxu1 }
 0x1ee   :  { %280 = vst.msk [vmem:[#allocation11] sm:$0xff] %vm279_vm3, %v276_v60 }
 0x1ef   :  { %469 = shalt.err (!%p466_p10)
}
 0x1f0   :  { %290 = dma.vmem_to_hbm [thread:$0]  %s288_s14, 128, %s576_s5, [#allocation5]  }
 0x1f1   :  { %484 = dma.done.wait [#allocation5], 128  }
 0x1f2   :  { %485 = vsyncadd [#allocation5], 4294967168 }
 0x1f3   :  { %294 = vsyncpa [#allocation4], 1 }
 0x1f4   :  { %295 = vsyncpa [#allocation7], 1 }
 0x1f5   :  { %296 = vsyncpa [#allocation10], 1 }
 0x1f6   :  { %297 = vsyncpa [#allocation5], 1 }

</bundles_post_ra>
